<compile_context>
chip_gen: v6e
topology: v6e:2x2x1
jax: 0.10.0
libtpu: 0.0.40
codegen_flags: <defaults>
</compile_context>

<pallas_src>
import functools

import jax
import jax.numpy as jnp
from jax import lax
from jax.experimental import pallas as pl
from jax.experimental.pallas import tpu as pltpu


def _trigger_kernel(img_ref, sel_ref, out_ref, *, patch_size, trigger_size):
    """Elementwise hot path over a (ct, patch_size, W*C) slab.

    img_ref : (ct, P, WC) native-dtype image rows, grouped per patch-row chunk
    sel_ref : (ct, 1, WC) uint8; nonzero where (patch selected) & (column in corner)
    out_ref : (ct, P, WC) uint8
    """
    lo = patch_size - trigger_size
    # Rows lo .. P-1 of every patch-row chunk lie inside the trigger corner.
    row_in = lax.broadcasted_iota(jnp.int32, (1, patch_size, 1), 1) >= lo
    m = (sel_ref[...] != 0) & row_in                    # (ct, P, WC) via broadcast

    x = img_ref[...]
    if jnp.issubdtype(img_ref.dtype, jnp.floating):
        # float input: overwrite, clip; f32->u8 cast truncates toward zero (numpy astype).
        y = jnp.where(m, jnp.float32(255.0), x.astype(jnp.float32))
        out_ref[...] = jnp.clip(y, 0.0, 255.0).astype(jnp.uint8)
    elif img_ref.dtype == jnp.uint8:
        # uint8 input is already in [0, 255]: single packed select, no widen, no clip.
        out_ref[...] = jnp.where(m, jnp.uint8(255), x)
    else:
        # other integer dtypes: widen in-register only, clip, narrow.
        y = jnp.where(m, jnp.int32(255), x.astype(jnp.int32))
        out_ref[...] = jnp.clip(y, 0, 255).astype(jnp.uint8)


def patch_based_trigger(img, patch_size, trigger_size, ratio=1.0, key=None,
                        *, target_block_bytes=4 * 1024 * 1024):
    """JAX/Pallas equivalent of PatchBasedTrigger.forward.

    img: (H, W, C) or batched (B, H, W, C) array, uint8 / float / int.
    Returns same leading shape with uint8 dtype.
    """
    squeeze = (img.ndim == 3)
    if squeeze:
        img = img[None]
    B, H, W, C = img.shape
    P = int(patch_size)
    lo = P - int(trigger_size)
    # TODO(synk): the PyTorch reference clamps ragged bottom edge patches when
    # H % patch_size != 0; here height must tile (ragged right edge in W is handled).
    assert H % P == 0, "image height must be a multiple of patch_size"
    nH = H // P
    nW = pl.cdiv(W, P)
    WC = W * C

    if key is None:
        key = jax.random.PRNGKey(0)
    # TODO(synk): python random.random() per patch replaced by a jax.random Bernoulli
    # draw; ratio semantics are preserved but the random sequence differs.
    patch_sel = jax.random.uniform(key, (B, nH, nW)) < jnp.float32(ratio)

    # Tiny column-expanded selection table (bytes = H*W*C / patch_size):
    # sel_cols[b*nH + pr, 0, w*C + c] = patch_sel[b, pr, w // P] & (w % P >= lo)
    w_idx = jnp.arange(W) // P
    col_in = (jnp.arange(W) % P) >= lo
    sel_w = jnp.take(patch_sel, w_idx, axis=-1) & col_in          # (B, nH, W) bool
    sel_cols = jnp.broadcast_to(sel_w[..., None].astype(jnp.uint8),
                                (B, nH, W, C)).reshape(B * nH, 1, WC)

    # View the image as patch-row chunks: pure contiguous reshape, no copy, no pad.
    n_chunks = B * nH
    img3 = img.reshape(n_chunks, P, WC)

    # Tile sizing: as many chunks per grid step as fit the byte budget (kernel is
    # pure HBM streaming), but keep >= 2 grid steps when possible so v7x's two
    # TensorCores both help saturate HBM and DMA overlaps compute/writeback.
    chunk_bytes = P * WC * (img.dtype.itemsize + 1) + WC
    ct = max(1, min(n_chunks, target_block_bytes // max(chunk_bytes, 1)))
    if n_chunks >= 2:
        ct = min(ct, pl.cdiv(n_chunks, 2))
    grid = (pl.cdiv(n_chunks, ct),)

    out3 = pl.pallas_call(
        functools.partial(_trigger_kernel, patch_size=P, trigger_size=int(trigger_size)),
        out_shape=jax.ShapeDtypeStruct((n_chunks, P, WC), jnp.uint8),
        grid=grid,
        in_specs=[
            pl.BlockSpec((ct, P, WC), lambda i: (i, 0, 0)),   # image chunk rows (native dtype)
            pl.BlockSpec((ct, 1, WC), lambda i: (i, 0, 0)),   # tiny selection table (u8)
        ],
        out_specs=pl.BlockSpec((ct, P, WC), lambda i: (i, 0, 0)),
        compiler_params=pltpu.CompilerParams(
            dimension_semantics=("parallel",),
            vmem_limit_bytes=32 * 1024 * 1024,   # double-buffered blocks fit v7x's 64 MiB VMEM
        ),
    )(img3, sel_cols)

    out = out3.reshape(B, H, W, C)
    return out[0] if squeeze else out


if __name__ == "__main__":
    import numpy as np

    # Small deterministic example: 16x16 RGB images, 8x8 patches, 3x3 trigger, ratio=1.
    H, W, C = 16, 16, 3
    patch_size, trigger_size, ratio = 8, 3, 1.0

    key = jax.random.PRNGKey(0)
    k_img, k_sel = jax.random.split(key)

    # Case 1: batched uint8 input (typical PIL path) -- exercises the native-u8
    # fast path and single-call batching.
    imgs_u8 = jax.random.randint(k_img, (2, H, W, C), 0, 256, dtype=jnp.int32).astype(jnp.uint8)
    out_u8 = jax.block_until_ready(
        patch_based_trigger(imgs_u8, patch_size, trigger_size, ratio=ratio, key=k_sel))

    # Case 2: single float image with values outside [0, 255] -- exercises the clip path.
    img_f32 = jax.random.uniform(k_img, (H, W, C), minval=-20.0, maxval=300.0)
    out_f32 = jax.block_until_ready(
        patch_based_trigger(img_f32, patch_size, trigger_size, ratio=ratio, key=k_sel))

    def reference(img):
        a = np.array(img).copy()
        lo = patch_size - trigger_size
        for i in range(0, H, patch_size):
            for j in range(0, W, patch_size):   # ratio == 1.0 -> every patch triggered
                a[i + lo:i + patch_size, j + lo:j + patch_size, :] = 255
        return np.clip(a, 0, 255).astype(np.uint8)

    assert out_u8.shape == (2, H, W, C) and out_u8.dtype == jnp.uint8
    assert out_f32.shape == (H, W, C) and out_f32.dtype == jnp.uint8
    for b in range(2):
        assert np.array_equal(np.array(out_u8[b]), reference(imgs_u8[b])), "uint8 path mismatch"
    assert np.array_equal(np.array(out_f32), reference(img_f32)), "float path mismatch"

    print("KERNEL_OK")
</pallas_src>

<mosaic_0001>
module attributes {stable_mosaic.version = 11 : i64} {
  func.func @_trigger_kernel(%arg0: i32, %arg1: memref<2x8x48xi8, #tpu.memory_space<vmem>>, %arg2: memref<2x1x48xi8, #tpu.memory_space<vmem>>, %arg3: memref<2x8x48xi8, #tpu.memory_space<vmem>>) attributes {dimension_semantics = [#tpu.dimension_semantics<parallel>], iteration_bounds = array<i64: 2>, scalar_prefetch = 0 : i64, scratch_operands = 0 : i64, tpu.core_type = #tpu.core_type<tc>, window_params = [{transform_indices = @transform_0, window_bounds = array<i64: 2, 8, 48>}, {transform_indices = @transform_1, window_bounds = array<i64: 2, 1, 48>}, {transform_indices = @transform_2, window_bounds = array<i64: 2, 8, 48>}]} {
    %0 = tpu.iota {dimensions = array<i32: 1>} : vector<1x8x1xi32>
    %c5_i32 = arith.constant 5 : i32
    %1 = vector.broadcast %c5_i32 : i32 to vector<1x8x1xi32>
    %2 = arith.cmpi sge, %0, %1 : vector<1x8x1xi32>
    %c0 = arith.constant 0 : index
    %c0_0 = arith.constant 0 : index
    %c0_1 = arith.constant 0 : index
    %3 = vector.load %arg2[%c0, %c0_0, %c0_1] : memref<2x1x48xi8, #tpu.memory_space<vmem>>, vector<2x1x48xi8>
    %c0_i8 = arith.constant 0 : i8
    %4 = vector.broadcast %c0_i8 : i8 to vector<2x1x48xi8>
    %5 = arith.cmpi ne, %3, %4 : vector<2x1x48xi8>
    %6 = vector.broadcast %5 : vector<2x1x48xi1> to vector<2x8x48xi1>
    %7 = vector.broadcast %2 : vector<1x8x1xi1> to vector<2x8x48xi1>
    %8 = arith.andi %6, %7 : vector<2x8x48xi1>
    %c0_2 = arith.constant 0 : index
    %c0_3 = arith.constant 0 : index
    %c0_4 = arith.constant 0 : index
    %9 = vector.load %arg1[%c0_2, %c0_3, %c0_4] : memref<2x8x48xi8, #tpu.memory_space<vmem>>, vector<2x8x48xi8>
    %c-1_i8 = arith.constant -1 : i8
    %10 = vector.broadcast %c-1_i8 : i8 to vector<2x8x48xi8>
    %11 = arith.select %8, %10, %9 : vector<2x8x48xi1>, vector<2x8x48xi8>
    %c0_5 = arith.constant 0 : index
    %c0_6 = arith.constant 0 : index
    %c0_7 = arith.constant 0 : index
    %12 = vector.load %arg3[%c0_5, %c0_6, %c0_7] : memref<2x8x48xi8, #tpu.memory_space<vmem>>, vector<2x8x48xi8>
    tpu.vector_store %arg3[%c0_5, %c0_6, %c0_7], %11 {strides = array<i32>} : memref<2x8x48xi8, #tpu.memory_space<vmem>>, vector<2x8x48xi8>,
    return
  }
  func.func @transform_0(%arg0: i32) -> (i32, i32, i32) {
    %c0_i32 = arith.constant 0 : i32
    %c0_i32_0 = arith.constant 0 : i32
    %c0_i32_1 = arith.constant 0 : i32
    return %arg0, %c0_i32, %c0_i32_0 : i32, i32, i32
  }
  func.func @transform_1(%arg0: i32) -> (i32, i32, i32) {
    %c0_i32 = arith.constant 0 : i32
    %c0_i32_0 = arith.constant 0 : i32
    %c0_i32_1 = arith.constant 0 : i32
    return %arg0, %c0_i32, %c0_i32_0 : i32, i32, i32
  }
  func.func @transform_2(%arg0: i32) -> (i32, i32, i32) {
    %c0_i32 = arith.constant 0 : i32
    %c0_i32_0 = arith.constant 0 : i32
    %c0_i32_1 = arith.constant 0 : i32
    return %arg0, %c0_i32, %c0_i32_0 : i32, i32, i32
  }
}

</mosaic_0001>

<bundles_post_ra>
// kernel: tpu_custom_call.1
= control target key start
LH: loop header
LB: loop body
LE: loop exit
PB: predicated region body
PF: predicated region fallthrough
CT: control target
= control target key end

     0   :  { %7 = vsyncpa [#allocation3], 0  ;;  %s674_s0 = inlined_call_operand.hbm [shape: u8[4,8,48], index: 0, kind: input, shape index: {}]   ;;  %s675_s1 = inlined_call_operand.vmem [shape: u8[4,1,48], index: 1, kind: input, shape index: {}]   ;;  %s676_s2 = inlined_call_operand.hbm [shape: u8[4,8,48], index: 2, kind: output, shape index: {}]  }
   0x1   :  { %9 = vsyncpa [#allocation3 + $0x1], 0 }
   0x2   :  { %10 = vsyncpa [#allocation4], 0 }
   0x3   :  { %12 = vsyncpa [#allocation4 + $0x1], 0  ;;  %s506_s9 = smov 0   ;;  %s508_s10 = smov 0  }
   0x4   :  { %s510_s11 = smov 0   ;;  %s512_s12 = smov 0  }
   0x5 LB: > { %s527_s13 = sadd.s32 4294967295, %s482_s12   ;;  %s322_s14 = sadd.s32 4294967294, %s482_s12   ;;  %s482_s12 = sphi %s512_s12, %s691_s12   ;;  %s478_s11 = sphi %s510_s11, %s690_s11   ;;  %s474_s10 = sphi %s508_s10, %s689_s10   ;;  %s470_s9 = sphi %s506_s9, %s688_s9  }
   0x6   : > { %s531_s15 = sadd.s32 1, %s482_s12   ;;  %s25_s16 = sadd.s32 1, %s478_s11 }
   0x7   : > { %s22_s17 = ssub.s32 %s482_s12, %s531_s15  ;;  %p32_p0 = scmp.ne.s32.totalorder %s478_s11, %s474_s10 }
   0x8   : > { %p23_p1 = scmp.eq.s32.totalorder %s22_s17, 0  ;;  %p33_p2 = scmp.eq.s32.totalorder %s482_s12, 0 }
   0x9   : > { %p38_p3 = scmp.ne.s32.totalorder %s474_s10, %s470_s9  ;;  %p39_p4 = scmp.eq.s32.totalorder %s527_s13, 0 }
   0xa   : > { %s543_s18 = scalar_select %p23_p1, %s478_s11, %s25_s16  }
   0xb   : > { %p545_p5 = por %p33_p2, %p32_p0  ;;  %p549_p6 = por %p39_p4, %p38_p3 }
   0xc   : > { %p88_p7 = scmp.eq.s32.totalorder %s527_s13, 1  ;;  %p94_p8 = scmp.eq.s32.totalorder %s322_s14, 1 }
   0xd   : > { %s680_s20 = scalar_select %p549_p6, 1, 0 }
   0xe   : > { %p351_p10 = scmp.lt.s32.totalorder %s482_s12, 2  ;;  %p556_p11 = por %p88_p7, %p32_p0 }
   0xf   : > { %p560_p12 = por %p94_p8, %p38_p3  ;;  %s114_s23 = sand.u32 1, %s478_s11  }
  0x10   : > { %s681_s21 = scalar_select %p556_p11, 1, 0 }
  0x11   : > { %s682_s22 = scalar_select %p560_p12, 1, 0 }
  0x12   : > { %s337_s24 = sshll.u32 %s482_s12, 6  ;;  %s325_s25 = sshll.u32 %s114_s23, 2 }
  0x13   : > { %s569_s28 = scalar_lea.hbm %s674_s0, %s337_s24  ;;  %s118_s29 = scalar_lea.vmem [#allocation2], %s325_s25 }
  0x14   : > { %s125_s30 = sshll.u32 %s118_s29, 4  ;;  %p573_p13 = pnand %p351_p10, %p545_p5  ;;  %s577_s30 = int_to_ptr.vmem [resolvable:$true] %s125_s30 }
  0x15   : > { %s579_s4 = scalar_lea.sflag [#allocation3], %s114_s23  ;;  %s390_s5 = scalar_lea.hbm %s569_s28, 64 }
  0x16   : > { %p391_p0 = scmp.ne.s32.totalorder %s569_s28, %s390_s5  ;;  %p392_p1 = pneg %p573_p13 }
  0x17   : > { %s395_s8 = scalar_lea.hbm %s674_s0, 128  ;;  %p396_p4 = scmp.lt.s32.totalorder %s569_s28, %s674_s0 }
  0x18   : > { %p393_p2 = pnand %p392_p1, %p391_p0  ;;  %p397_p5 = scmp.lt.s32.totalorder %s395_s8, %s390_s5 }
  0x1a   : > { %p394_p3 = pneg %p393_p2  ;;  %p398_p7 = por %p397_p5, %p396_p4 }
  0x1c   : > { %p399_p8 = pnand %p398_p7, %p394_p3 }
  0x1e   : > { %402 = shalt.err (!%p399_p8)
}
  0x1f   : > { %s403_s17 = scalar_lea.vmem %s577_s30, 64  ;;  %s484_s19 = smov [#allocation2]  }
  0x20   : > { %p404_p10 = scmp.ne.s32.totalorder %s577_s30, %s403_s17  ;;  %s408_s23 = sshll.u32 %s484_s19, 4  ;;  %s409_s23 = int_to_ptr.vmem [resolvable:$false] %s408_s23 }
  0x21   : > { %s410_s24 = scalar_lea.vmem %s409_s23, 128  ;;  %p411_p2 = scmp.lt.s32.totalorder %s577_s30, %s409_s23 }
  0x22   : > { %p406_p9 = pnand %p404_p10, %p392_p1  ;;  %p412_p12 = scmp.lt.s32.totalorder %s410_s24, %s403_s17 }
  0x24   : > { %p407_p0 = pneg %p406_p9  ;;  %p413_p11 = por %p412_p12, %p411_p2 }
  0x26   : > { %p414_p6 = pnand %p413_p11, %p407_p0 }
  0x28   : > { %417 = shalt.err (!%p414_p6)
}
  0x29   : > { %s485_s25 = smov 32   ;;  %s486_s26 = smov 2  }
  0x2a   : > { %346 = dma.hbm_to_vmem [thread:$0]  (!%p573_p13), %s569_s28, 64, %s577_s30, %s579_s4, %s485_s25, %s485_s25, %s486_s26  }
  0x2b   : > { %p328_p9 = scmp.ge.s32.totalorder %s482_s12, 1  ;;  %p141_p1 = scmp.lt.s32.totalorder %s482_s12, 3 }
  0x2d   : > { %p142_p3 = pnand %p328_p9, %p141_p1 }
  0x2e   : > { %s603_s27 = sand.u32 (!%p142_p3), 1, %s474_s10   ;;  %p684_p6 = scmp.ne.s32.totalorder (!%p142_p3), %s680_s20, 0 }
  0x2f   : > { %145 = sbr.rel (%p142_p3) target bundleno = 89 (0x59), region = 28  ;;  %s329_s29 = sshll.u32 (!%p142_p3), %s603_s27, 2 }
  0x30   : > { %s148_s5 = scalar_lea.sflag (!%p142_p3), [#allocation3], %s603_s27  ;;  %s609_s6 = scalar_lea.vmem (!%p142_p3), [#allocation2], %s329_s29 }
  0x34   : > { %461 = dma.done.wait (%p684_p6), %s148_s5, 64  }
  0x35   : > { %463 = vsyncadd (%p684_p6), %s148_s5, 4294967232  ;;  %s331_s28 = sshll.u32 %s527_s13, 1  ;;  %v186_v0 = vlaneseq  ;;  %v487_v4 = vmov 0   ;;  %v215_v14 = vld [vmem:[%s609_s6] sm:$0x3]  ;;  %s175_s20 = scalar_lea.vmem [#allocation5], %s329_s29 }
  0x36   : > { %p178_p11 = scmp.lt.s32.totalorder %s331_s28, 3  ;;  %s240_s7 = sshll.u32 %s175_s20, 4  ;;  %vm223_vm9 = vcmask 386048   ;;  %v216_v16 = vld [vmem:[%s609_s6 + $0x2] sm:$0x3]  ;;  %s624_s7 = int_to_ptr.vmem [resolvable:$true] %s240_s7 }
  0x37   : > { %v187_v1 = vshrl.u32 %v186_v0, 7  ;;  %s338_s8 = sshll.u32 %s527_s13, 6  ;;  %s227_s13 = scalar_lea.sflag [#allocation4], %s603_s27 }
  0x38   : > { %s693_s28 = smov (!%p178_p11, %s331_s28), 3  ;;  %s631_s17 = scalar_lea.hbm %s676_s2, %s338_s8 }
  0x39   : > { %s180_s4 = scalar_lea.vmem %s675_s1, %s693_s28  ;;  %v203_v8 = vsub.s32 0, %v187_v1  ;;  %vm188_vm4 = vcmp.ge.s32.totalorder %v187_v1, 5  ;;  %s418_s19 = scalar_lea.vmem %s624_s7, 64 }
  0x3a   : > { %v189_v2 = vld [vmem:[%s180_s4] sm:$0x1]  ;;  %v190_v3 = vld [vmem:[%s180_s4 + $0x1] sm:$0x1]  ;;  %p419_p12 = scmp.ne.s32.totalorder %s624_s7, %s418_s19  ;;  %p685_p13 = scmp.ne.s32.totalorder %s681_s21, 0 }
  0x3b   : > { %vm191_vm0 = vnez %v189_v2  ;;  %vm192_vm1 = vnez %v190_v3  ;;  %s488_s23 = smov [#allocation5]  }
  0x3c   : > { %v193_v5 = vsel %vm191_vm0, 16843009, %v487_v4  ;;  %v194_v6 = vsel %vm192_vm1, 16843009, %v487_v4  ;;  %p420_p4 = pnand %p419_p12, %p685_p13  ;;  %s422_s24 = sshll.u32 %s488_s23, 4  ;;  %s423_s24 = int_to_ptr.vmem [resolvable:$false] %s422_s24 }
  0x3d   : > { %v195_v7 = vunpack.c.0.s8 %v193_v5  ;;  %v196_v9 = vunpack.c.0.s8 %v194_v6  ;;  %s424_s25 = scalar_lea.vmem %s423_s24, 128  ;;  %p425_p7 = scmp.lt.s32.totalorder %s624_s7, %s423_s24 }
  0x3e   : > { %p421_p5 = pneg %p420_p4  ;;  %p426_p8 = scmp.lt.s32.totalorder %s424_s25, %s418_s19 }
  0x3f   : > { %vm197_vm2 = vcmp.ne.s32.totalorder %v195_v7, 0  ;;  %vm198_vm3 = vcmp.ne.s32.totalorder %v196_v9, 0 }
  0x40   : > { %v199_v10 = vsel %vm197_vm2, 1, %v487_v4  ;;  %v200_v11 = vsel %vm198_vm3, 1, %v487_v4  ;;  %p427_p10 = por %p426_p8, %p425_p7 }
  0x41   : > { %v204_v12 = vrot.slane %v199_v10, %v203_v8  ;;  %v208_v13 = vrot.slane %v200_v11, %v203_v8 }
  0x42   : > { %p428_p0 = pnand %p427_p10, %p421_p5 }
  0x43   : > { %vm209_vm5 = vcmp.eq.s32.totalorder %v204_v12, 1  ;;  %vm210_vm7 = vcmp.eq.s32.totalorder %v208_v13, 1 }
  0x44   : > { %vm213_vm6 = vmand %vm209_vm5, %vm188_vm4 }
  0x45   : > { %vm217_vm8 = vmpackc.low %vm213_vm6, %vm213_vm6 }
  0x46   : > { %vm218_vm10 = vmpackc.even %vm217_vm8, %vm217_vm8 }
  0x47   : > { %v221_v15 = vsel %vm218_vm10, 4294967295, %v215_v14  ;;  %vm214_vm11 = vmand %vm210_vm7, %vm188_vm4 }
  0x48   : > { %224 = vst.msk [vmem:[%s175_s20] sm:$0x3] %vm223_vm9, %v221_v15  ;;  %vm219_vm12 = vmpackc.low %vm214_vm11, %vm214_vm11 }
  0x49   : > { %vm220_vm13 = vmpackc.even %vm219_vm12, %vm219_vm12 }
  0x4a   : > { %v222_v17 = vsel %vm220_vm13, 4294967295, %v216_v16 }
  0x4b   : > { %225 = vst.msk [vmem:[%s175_s20 + $0x2] sm:$0x3] %vm223_vm9, %v222_v17 }
  0x4c   : > { %431 = shalt.err (!%p428_p0)
}
  0x4d   : > { %s432_s26 = scalar_lea.hbm %s631_s17, 64  ;;  %s436_s6 = scalar_lea.hbm %s676_s2, 128 }
  0x4e   : > { %p433_p2 = scmp.ne.s32.totalorder %s631_s17, %s432_s26  ;;  %p437_p3 = scmp.lt.s32.totalorder %s631_s17, %s676_s2 }
  0x4f   : > { %p438_p6 = scmp.lt.s32.totalorder %s436_s6, %s432_s26 }
  0x50   : > { %p434_p9 = pnand %p433_p2, %p685_p13 }
  0x51   : > { %p439_p11 = por %p438_p6, %p437_p3 }
  0x52   : > { %p435_p1 = pneg %p434_p9 }
  0x54   : > { %p440_p12 = pnand %p439_p11, %p435_p1 }
  0x56   : > { %443 = shalt.err (!%p440_p12)
}
  0x57   : > { %s489_s3 = smov 32   ;;  %s490_s4 = smov 2  }
  0x58   : > { %341 = dma.vmem_to_hbm [thread:$0]  (%p685_p13), %s624_s7, 64, %s631_s17, %s227_s13, %s489_s3, %s489_s3, %s490_s4  }
  0x59 PF: > { %s255_s20 = sand.u32 1, %s470_s9   ;;  %p686_p4 = scmp.ne.s32.totalorder %s682_s22, 0 }
  0x5a   : > { %p687_p5 = scmp.ge.s32.totalorder %s482_s12, 2  ;;  %s256_s8 = scalar_lea.sflag [#allocation4], %s255_s20 }
  0x5c   : > { %p348_p7 = pnand %p687_p5, %p686_p4 }
  0x5e   : > { %p349_p8 = pneg %p348_p7 }
  0x60   : > { %465 = dma.done.wait (%p349_p8), %s256_s8, 64  }
  0x61   : > { %467 = vsyncadd (%p349_p8), %s256_s8, 4294967232  ;;  %p15_p10 = scmp.ge.s32.totalorder %s531_s15, 4   ;;  %s688_s9 = smov %s474_s10 }
  0x62   : > { %s689_s10 = smov %s478_s11  ;;  %s690_s11 = smov %s543_s18 }
  0x63   : > { %s691_s12 = smov %s531_s15  ;;  %17 = sbr.rel (!%p15_p10) target bundleno = 5 (0x5), region = 76 }
  0x68   :  { %261 = vsyncpa [#allocation3], 1 }
  0x69   :  { %263 = vsyncpa [#allocation3 + $0x1], 1 }
  0x6a   :  { %264 = vsyncpa [#allocation4], 1 }
  0x6b   :  { %266 = vsyncpa [#allocation4 + $0x1], 1 }

</bundles_post_ra>
